<compile_context>
chip_gen: v7x
topology: tpu7x:2x2x1
jax: 0.10.0
libtpu: 0.0.40
codegen_flags: <defaults>
</compile_context>

<pallas_src>
import functools

import jax
import jax.numpy as jnp
from jax.experimental import pallas as pl
from jax.experimental.pallas import tpu as pltpu


_ROW_TILE_CAP = 256      # rows per block (multiple of 8): bounds VMEM for big
                         # N*C and yields many parallel row blocks on v7x
_LANE_TILE_CAP = 16384   # allow very wide lane tiles (review #6)


def _round_up(x, m):
    return ((x + m - 1) // m) * m


def _vmem_config():
    """Generation-aware (vmem_limit, pass1_budget, pass2_budget) in bytes."""
    cap = 64 << 20
    try:
        info = pltpu.get_tpu_info()
        cap = int(getattr(info, "vmem_capacity_bytes", cap) or cap)
    except Exception:
        pass
    if cap >= (128 << 20):                        # v5e / v6e: 128 MiB physical
        return (100 << 20), (64 << 20), (48 << 20)
    return (48 << 20), (24 << 20), (16 << 20)     # v7x-class: 64 MiB physical


def _pick_rows(rows):
    return rows if rows <= _ROW_TILE_CAP else _ROW_TILE_CAP


def _pick_pass1_lane_tile(hw, r_tile, itemsize, budget):
    if hw < 128:
        return hw                                  # full-dim block
    t = (budget // (2 * r_tile * itemsize)) // 128 * 128
    return max(128, min(t, _LANE_TILE_CAP, (hw // 128) * 128))


def _pick_pass2_lane_tile(hw, r_tile, itemsize, budget):
    if hw < 128:
        return hw
    half = _round_up(-(-hw // 2), 128)             # force >=2 HW blocks (review #4)
    t = (budget // (2 * r_tile * itemsize)) // 128 * 128
    return max(128, min(t, _LANE_TILE_CAP, (hw // 128) * 128, half))


# --------------------------------------------------------------------------
# Pass 1: streamed global sum over HW -> (N*C, 1) f32
# --------------------------------------------------------------------------
def _pool_sum_kernel(x_ref, sum_ref, acc_ref, *, hw, hw_tile, chunks, ragged):
    # x_ref:   (r_tile, hw_tile)  one HW tile of the flattened (N*C, HW) input
    # sum_ref: (r_tile, 1)        per-row global sum (written on the last step)
    # acc_ref: (r_tile, acc_w)    lane-wise f32 accumulator (VPU adds only)
    i = pl.program_id(1)
    last = pl.num_programs(1) - 1

    @pl.when(i == 0)
    def _():
        acc_ref[...] = jnp.zeros_like(acc_ref)

    def make_accum(masked):
        def body():
            base = i * hw_tile
            for (off, width) in chunks:
                xk = x_ref[:, off:off + width].astype(jnp.float32)
                if masked:
                    col = base + off + jax.lax.broadcasted_iota(
                        jnp.int32, xk.shape, dimension=1)
                    xk = jnp.where(col < hw, xk, 0.0)
                acc_ref[...] += xk                 # plain VPU add, no XLU
        return body

    if ragged:
        # Only the last HW step can touch out-of-range lanes; keep the common
        # path select-free.
        pl.when(i != last)(make_accum(False))
        pl.when(i == last)(make_accum(True))
    else:
        make_accum(False)()

    @pl.when(i == last)
    def _():
        # Single cross-lane reduce for the whole row block (XLU, once).
        sum_ref[...] = jnp.sum(acc_ref[...], axis=-1, keepdims=True)


# --------------------------------------------------------------------------
# Pass 2: bilinear upsample of a 1x1 map == lane-dense broadcast over HW
# --------------------------------------------------------------------------
def _broadcast_kernel(z_ref, o_ref):
    # z_ref: (r_tile, 1)        post-ReLU values (N*O rows)
    # o_ref: (r_tile, hw_tile)  lane-dense output tile
    o_ref[...] = jnp.broadcast_to(z_ref[...].astype(o_ref.dtype), o_ref.shape)


# --------------------------------------------------------------------------
# Wrapper
# --------------------------------------------------------------------------
def image_pool_forward(x, conv_w, bn_gamma, bn_beta, bn_mean, bn_var, eps=1e-5):
    """x: (N, C, H, W). conv_w: (O, C, 1, 1). Returns (N, O, H, W)."""
    N, C, H, W = x.shape
    O = conv_w.shape[0]
    HW = H * W
    R = N * C
    itemsize = jnp.dtype(x.dtype).itemsize
    vmem_limit, budget1, budget2 = _vmem_config()

    # ---- pass 1: streamed per-(n, c) global sum over HW ----
    r_tile = _pick_rows(R)
    hw_tile = _pick_pass1_lane_tile(HW, r_tile, itemsize, budget1)
    if hw_tile >= 128:
        chunks = tuple((k * 128, 128) for k in range(hw_tile // 128))
    else:
        chunks = ((0, hw_tile),)                   # HW < 128: single narrow chunk
    acc_w = chunks[0][1]
    ragged = (HW % hw_tile) != 0
    grid1 = (pl.cdiv(R, r_tile), pl.cdiv(HW, hw_tile))

    x2 = x.reshape(R, HW)
    kernel1 = functools.partial(_pool_sum_kernel, hw=HW, hw_tile=hw_tile,
                                chunks=chunks, ragged=ragged)
    ce1 = pl.CostEstimate(flops=R * HW, transcendentals=0,
                          bytes_accessed=R * HW * itemsize + R * 4)
    sums = pl.pallas_call(
        kernel1,
        out_shape=jax.ShapeDtypeStruct((R, 1), jnp.float32),
        grid=grid1,
        in_specs=[pl.BlockSpec((r_tile, hw_tile), lambda r, i: (r, i))],
        out_specs=pl.BlockSpec((r_tile, 1), lambda r, i: (r, 0)),
        scratch_shapes=[pltpu.VMEM((r_tile, acc_w), jnp.float32)],
        compiler_params=pltpu.CompilerParams(
            dimension_semantics=("parallel", "arbitrary"),
            vmem_limit_bytes=vmem_limit),
        cost_estimate=ce1,
    )(x2)

    # ---- tiny epilogue: folded 1x1 conv + BN (eval) + ReLU on (N, C) sums ----
    w2 = conv_w.reshape(O, C).astype(jnp.float32)
    scale = bn_gamma.astype(jnp.float32) * jax.lax.rsqrt(
        bn_var.astype(jnp.float32) + eps)                       # (O,)
    bias = bn_beta.astype(jnp.float32) - bn_mean.astype(jnp.float32) * scale
    wf = (w2 * scale[:, None] * (1.0 / HW)).T                   # (C, O), 1/HW folded
    pooled_sum = sums.reshape(N, C)                             # f32 sums
    z = jnp.maximum(pooled_sum @ wf + bias[None, :], 0.0)       # (N, O) f32

    # ---- pass 2: lane-dense broadcast over HW (both axes parallel) ----
    R2 = N * O
    r2_tile = _pick_rows(R2)
    hwb_tile = _pick_pass2_lane_tile(HW, r2_tile, itemsize, budget2)
    grid2 = (pl.cdiv(R2, r2_tile), pl.cdiv(HW, hwb_tile))
    z2 = z.reshape(R2, 1)
    ce2 = pl.CostEstimate(flops=0, transcendentals=0,
                          bytes_accessed=R2 * HW * itemsize + R2 * 4)
    out2 = pl.pallas_call(
        _broadcast_kernel,
        out_shape=jax.ShapeDtypeStruct((R2, HW), x.dtype),
        grid=grid2,
        in_specs=[pl.BlockSpec((r2_tile, 1), lambda r, i: (r, 0))],
        out_specs=pl.BlockSpec((r2_tile, hwb_tile), lambda r, i: (r, i)),
        compiler_params=pltpu.CompilerParams(
            dimension_semantics=("parallel", "parallel"),
            vmem_limit_bytes=vmem_limit),
        cost_estimate=ce2,
    )(z2)

    return out2.reshape(N, O, H, W)


# --------------------------------------------------------------------------
# Pure-JAX reference of the same forward pass
# --------------------------------------------------------------------------
def _reference(x, conv_w, bn_gamma, bn_beta, bn_mean, bn_var, eps=1e-5):
    N, C, H, W = x.shape
    O = conv_w.shape[0]
    pooled = jnp.mean(x.astype(jnp.float32), axis=(2, 3))                 # (N, C)
    z = pooled @ conv_w.reshape(O, C).astype(jnp.float32).T               # (N, O)
    z = (z - bn_mean) * jax.lax.rsqrt(bn_var + eps) * bn_gamma + bn_beta
    z = jnp.maximum(z, 0.0)
    return jnp.broadcast_to(z[:, :, None, None], (N, O, H, W)).astype(x.dtype)


if __name__ == "__main__":
    def _run_case(key, N, C, O, H, W):
        ks = jax.random.split(key, 6)
        x = jax.random.normal(ks[0], (N, C, H, W), dtype=jnp.float32)
        conv_w = jax.random.normal(ks[1], (O, C, 1, 1), dtype=jnp.float32) * 0.1
        bn_gamma = 1.0 + 0.1 * jax.random.normal(ks[2], (O,), dtype=jnp.float32)
        bn_beta = 0.1 * jax.random.normal(ks[3], (O,), dtype=jnp.float32)
        bn_mean = 0.05 * jax.random.normal(ks[4], (O,), dtype=jnp.float32)
        bn_var = 1.0 + 0.1 * jax.random.uniform(ks[5], (O,), dtype=jnp.float32)

        out = jax.block_until_ready(
            image_pool_forward(x, conv_w, bn_gamma, bn_beta, bn_mean, bn_var))
        ref = _reference(x, conv_w, bn_gamma, bn_beta, bn_mean, bn_var)
        assert out.shape == (N, O, H, W)
        assert jnp.allclose(out, ref, atol=1e-5, rtol=1e-5), (
            f"mismatch vs reference for (N,C,O,H,W)={(N, C, O, H, W)}")

    root = jax.random.PRNGKey(0)
    k1, k2 = jax.random.split(root)
    _run_case(k1, 2, 4, 8, 16, 16)   # demo shape implied by the module (in_ch=4)
    _run_case(k2, 2, 4, 8, 15, 15)   # ragged HW: exercises in-kernel tail masking
    print("KERNEL_OK")
</pallas_src>

<mosaic_0001>
module attributes {stable_mosaic.version = 11 : i64} {
  func.func @_pool_sum_kernel(%arg0: i32, %arg1: i32, %arg2: memref<8x256xf32, #tpu.memory_space<vmem>>, %arg3: memref<8x1xf32, #tpu.memory_space<vmem>>, %arg4: memref<8x128xf32, #tpu.memory_space<vmem>>) attributes {dimension_semantics = [#tpu.dimension_semantics<parallel>, #tpu.dimension_semantics<arbitrary>], iteration_bounds = array<i64: 1, 1>, scalar_prefetch = 0 : i64, scratch_operands = 1 : i64, tpu.core_type = #tpu.core_type<tc>, window_params = [{transform_indices = @transform_0, window_bounds = array<i64: 8, 256>}, {transform_indices = @transform_1, window_bounds = array<i64: 8, 1>}]} {
    %c0_i32 = arith.constant 0 : i32
    %0 = arith.cmpi eq, %arg1, %c0_i32 : i32
    %1 = arith.extui %0 : i1 to i32
    %c0_i32_0 = arith.constant 0 : i32
    %2 = arith.cmpi ne, %1, %c0_i32_0 : i32
    scf.if %2 {
      %cst = arith.constant 0.000000e+00 : f32
      %14 = vector.broadcast %cst : f32 to vector<8x128xf32>
      %c0_13 = arith.constant 0 : index
      %c0_14 = arith.constant 0 : index
      %15 = vector.load %arg4[%c0_13, %c0_14] : memref<8x128xf32, #tpu.memory_space<vmem>>, vector<8x128xf32>
      tpu.vector_store %arg4[%c0_13, %c0_14], %14 {strides = array<i32>} : memref<8x128xf32, #tpu.memory_space<vmem>>, vector<8x128xf32>,
    } else {
    }
    %c0 = arith.constant 0 : index
    %c0_1 = arith.constant 0 : index
    %3 = vector.load %arg2[%c0, %c0_1] : memref<8x256xf32, #tpu.memory_space<vmem>>, vector<8x128xf32>
    %c0_2 = arith.constant 0 : index
    %c0_3 = arith.constant 0 : index
    %4 = vector.load %arg4[%c0_2, %c0_3] : memref<8x128xf32, #tpu.memory_space<vmem>>, vector<8x128xf32>
    %5 = arith.addf %4, %3 : vector<8x128xf32>
    %c0_4 = arith.constant 0 : index
    %c0_5 = arith.constant 0 : index
    %6 = vector.load %arg4[%c0_4, %c0_5] : memref<8x128xf32, #tpu.memory_space<vmem>>, vector<8x128xf32>
    tpu.vector_store %arg4[%c0_4, %c0_5], %5 {strides = array<i32>} : memref<8x128xf32, #tpu.memory_space<vmem>>, vector<8x128xf32>,
    %c0_6 = arith.constant 0 : index
    %c128 = arith.constant 128 : index
    %7 = vector.load %arg2[%c0_6, %c128] : memref<8x256xf32, #tpu.memory_space<vmem>>, vector<8x128xf32>
    %c0_7 = arith.constant 0 : index
    %c0_8 = arith.constant 0 : index
    %8 = vector.load %arg4[%c0_7, %c0_8] : memref<8x128xf32, #tpu.memory_space<vmem>>, vector<8x128xf32>
    %9 = arith.addf %8, %7 : vector<8x128xf32>
    %c0_9 = arith.constant 0 : index
    %c0_10 = arith.constant 0 : index
    %10 = vector.load %arg4[%c0_9, %c0_10] : memref<8x128xf32, #tpu.memory_space<vmem>>, vector<8x128xf32>
    tpu.vector_store %arg4[%c0_9, %c0_10], %9 {strides = array<i32>} : memref<8x128xf32, #tpu.memory_space<vmem>>, vector<8x128xf32>,
    %c0_i32_11 = arith.constant 0 : i32
    %11 = arith.cmpi eq, %arg1, %c0_i32_11 : i32
    %12 = arith.extui %11 : i1 to i32
    %c0_i32_12 = arith.constant 0 : i32
    %13 = arith.cmpi ne, %12, %c0_i32_12 : i32
    scf.if %13 {
      %c0_13 = arith.constant 0 : index
      %c0_14 = arith.constant 0 : index
      %14 = vector.load %arg4[%c0_13, %c0_14] : memref<8x128xf32, #tpu.memory_space<vmem>>, vector<8x128xf32>
      %cst = arith.constant dense<0.000000e+00> : vector<8xf32>
      %15 = vector.multi_reduction <add>, %14, %cst [1] : vector<8x128xf32> to vector<8xf32>
      %16 = vector.shape_cast %15 : vector<8xf32> to vector<8x1xf32>
      %c0_15 = arith.constant 0 : index
      %c0_16 = arith.constant 0 : index
      %17 = vector.load %arg3[%c0_15, %c0_16] : memref<8x1xf32, #tpu.memory_space<vmem>>, vector<8x1xf32>
      tpu.vector_store %arg3[%c0_15, %c0_16], %16 {strides = array<i32>} : memref<8x1xf32, #tpu.memory_space<vmem>>, vector<8x1xf32>,
    } else {
    }
    return
  }
  func.func @transform_0(%arg0: i32, %arg1: i32) -> (i32, i32) {
    %c0_i32 = arith.constant 0 : i32
    return %arg0, %arg1 : i32, i32
  }
  func.func @transform_1(%arg0: i32, %arg1: i32) -> (i32, i32) {
    %c0_i32 = arith.constant 0 : i32
    %c0_i32_0 = arith.constant 0 : i32
    return %arg0, %c0_i32 : i32, i32
  }
}

</mosaic_0001>

<bundles_post_ra>
// kernel: tpu_custom_call.1
= control target key start
LH: loop header
LB: loop body
LE: loop exit
PB: predicated region body
PF: predicated region fallthrough
CT: control target
= control target key end

     0   :  { %6 = vsyncpa [#allocation4], 0  ;;  %s71_s6 = smov [#allocation3]   ;;  %s97_s0 = inlined_call_operand.hbm [shape: f32[8,256], index: 0, kind: input, shape index: {}]   ;;  %s98_s1 = inlined_call_operand.vmem [shape: f32[8,1], index: 1, kind: output, shape index: {}]  }
   0x1   :  { %s13_s7 = sshll.u32 %s71_s6, 4  ;;  %s47_s10 = scalar_lea.hbm %s97_s0, 256  ;;  %s14_s7 = int_to_ptr.vmem [resolvable:$true] %s13_s7 }
   0x2   :  { %p48_p0 = scmp.ne.s32.totalorder %s97_s0, %s47_s10  ;;  %p51_p1 = scmp.lt.u32.totalorder %s47_s10, %s97_s0 }
   0x4   :  { %p53_p2 = pnand %p51_p1, %p48_p0 }
   0x6   :  { %56 = shalt.err (!%p53_p2)
}
   0x7   :  { %s57_s15 = scalar_lea.vmem %s14_s7, 256  ;;  %p62_p4 = scmp.lt.s32.totalorder %s14_s7, %s14_s7 }
   0x8   :  { %p58_p3 = scmp.ne.s32.totalorder %s14_s7, %s57_s15  ;;  %p63_p5 = scmp.lt.s32.totalorder %s57_s15, %s57_s15 }
   0xa   :  { %p64_p6 = por %p63_p5, %p62_p4 }
   0xc   :  { %p65_p7 = pnand %p64_p6, %p58_p3 }
   0xe   :  { %68 = shalt.err (!%p65_p7)
}
   0xf   :  { %16 = dma.hbm_to_vmem [thread:$0]  %s97_s0, 256, %s14_s7, [#allocation4]  }
  0x10   :  { %69 = dma.done.wait [#allocation4], 256  }
  0x11   :  { %70 = vsyncadd [#allocation4], 4294967040  ;;  %v25_v0 = vld [vmem:[#allocation3] sm:$0xff]  ;;  %v29_v1 = vld [vmem:[#allocation3 + $0x8] sm:$0xff]  ;;  %vm39_vm0 = vcmask 7168  }
  0x12   :  { %v31_v2 = vadd.f32 %v29_v1, %v25_v0 }
  0x14   :  { %37 = vadd.xlane.f32.xlu0 %v31_v2 }
  0xa1   :  { %v38_v3 = vpop.xlane.xlu0 %37 }
  0xa2   :  { %40 = vst.msk [vmem:[%s98_s1] sm:$0xff] %vm39_vm0, %v38_v3 }
  0xa3   :  { %45 = vsyncpa [#allocation4], 1 }

</bundles_post_ra>
